<compile_context>
chip_gen: v6e
topology: v6e:2x2x1
jax: 0.10.0
libtpu: 0.0.40
codegen_flags: <defaults>
</compile_context>

<pallas_src>
import functools

import jax
import jax.numpy as jnp
from jax.experimental import pallas as pl
from jax.experimental.pallas import tpu as pltpu

D_IN = 784
D_H = 256
D_OUT = 10
D_IN_PAD = 896     # 7 * 128 : full-width K lane-tiles for fc0
D_OUT_PAD = 128    # lane-dense output block for fc2 + log_softmax + store
NEG_INF = -1e30    # padded logit bias -> exp underflows to 0, max/lse correct


def _round_up(x, m):
    return ((x + m - 1) // m) * m


def _mlp_kernel(x_ref, w0_ref, b0_ref, w1_ref, b1_ref, w2_ref, b2_ref, o_ref):
    # x / weights are bf16; the MXU consumes them directly and accumulates f32.
    x = x_ref[...]

    # fc0 + ReLU   (dropout p=0.5, eval mode == identity)
    h1 = jnp.dot(x, w0_ref[...], preferred_element_type=jnp.float32) + b0_ref[...]
    h1 = jnp.maximum(h1, 0.0).astype(jnp.bfloat16)

    # fc1 + ReLU   (dropout p=0.5, eval mode == identity)
    h2 = jnp.dot(h1, w1_ref[...], preferred_element_type=jnp.float32) + b1_ref[...]
    h2 = jnp.maximum(h2, 0.0).astype(jnp.bfloat16)

    # fc2 (padded to 128 output lanes; padded columns carry bias = -1e30)
    logits = jnp.dot(h2, w2_ref[...], preferred_element_type=jnp.float32) + b2_ref[...]

    # log_softmax over the class axis, in f32.
    m = jnp.max(logits, axis=1, keepdims=True)
    shifted = logits - m
    lse = jnp.log(jnp.sum(jnp.exp(shifted), axis=1, keepdims=True))
    o_ref[...] = (shifted - lse).astype(o_ref.dtype)


@functools.partial(jax.jit, static_argnames=("batch_tile",))
def mnist_mlp_forward(x, w0, b0, w1, b1, w2, b2, *, batch_tile=256):
    """x: (B, 784) f32.  Weights stored (in, out); biases (1, out).  Returns (B, 10) f32."""
    B, d_in = x.shape
    assert d_in == D_IN and w0.shape == (D_IN, D_H)
    assert w1.shape == (D_H, D_H) and w2.shape == (D_H, D_OUT)

    # Effective batch tile: multiple of 8, no larger than the (rounded) batch.
    bt = _round_up(min(batch_tile, B), 8)
    Bp = _round_up(B, bt)
    grid = (Bp // bt,)

    # Host-side (jit-fused) padding + bf16 casts.
    xp = jnp.pad(x, ((0, Bp - B), (0, D_IN_PAD - D_IN))).astype(jnp.bfloat16)
    w0p = jnp.pad(w0, ((0, D_IN_PAD - D_IN), (0, 0))).astype(jnp.bfloat16)
    w1b = w1.astype(jnp.bfloat16)
    w2p = jnp.pad(w2, ((0, 0), (0, D_OUT_PAD - D_OUT))).astype(jnp.bfloat16)
    b0f = b0.astype(jnp.float32)
    b1f = b1.astype(jnp.float32)
    b2p = jnp.pad(b2.astype(jnp.float32), ((0, 0), (0, D_OUT_PAD - D_OUT)),
                  constant_values=NEG_INF)

    out = pl.pallas_call(
        _mlp_kernel,
        out_shape=jax.ShapeDtypeStruct((Bp, D_OUT_PAD), jnp.float32),
        grid_spec=pltpu.PrefetchScalarGridSpec(
            num_scalar_prefetch=0,
            grid=grid,
            in_specs=[
                pl.BlockSpec((bt, D_IN_PAD), lambda i: (i, 0)),        # x tile (bf16)
                pl.BlockSpec((D_IN_PAD, D_H), lambda i: (0, 0)),       # w0 (bf16)
                pl.BlockSpec((1, D_H), lambda i: (0, 0)),              # b0 (f32)
                pl.BlockSpec((D_H, D_H), lambda i: (0, 0)),            # w1 (bf16)
                pl.BlockSpec((1, D_H), lambda i: (0, 0)),              # b1 (f32)
                pl.BlockSpec((D_H, D_OUT_PAD), lambda i: (0, 0)),      # w2 (bf16, padded)
                pl.BlockSpec((1, D_OUT_PAD), lambda i: (0, 0)),        # b2 (f32, -1e30 pad)
            ],
            out_specs=pl.BlockSpec((bt, D_OUT_PAD), lambda i: (i, 0)), # lane-dense store
        ),
        compiler_params=pltpu.CompilerParams(
            dimension_semantics=("parallel",),   # megacore sharding on v7x
            vmem_limit_bytes=64 << 20,
        ),
    )(xp, w0p, b0f, w1b, b1f, w2p, b2p)

    return out[:B, :D_OUT]


def init_params(key):
    """Deterministic init matching nn.Linear shapes (weights stored transposed)."""
    k0, k1, k2, k3, k4, k5 = jax.random.split(key, 6)

    def linear_init(kw, kb, fan_in, fan_out):
        bound = 1.0 / jnp.sqrt(fan_in)
        w = jax.random.uniform(kw, (fan_in, fan_out), jnp.float32, -bound, bound)
        b = jax.random.uniform(kb, (1, fan_out), jnp.float32, -bound, bound)
        return w, b

    w0, b0 = linear_init(k0, k1, D_IN, D_H)
    w1, b1 = linear_init(k2, k3, D_H, D_H)
    w2, b2 = linear_init(k4, k5, D_H, D_OUT)
    return w0, b0, w1, b1, w2, b2


if __name__ == "__main__":
    key = jax.random.PRNGKey(0)
    kx, kp = jax.random.split(key)

    # Small, deterministic example: batch=8 MNIST vectors (784 features).
    B = 8
    x = jax.random.normal(kx, (B, D_IN), jnp.float32)
    w0, b0, w1, b1, w2, b2 = init_params(kp)

    out = mnist_mlp_forward(x, w0, b0, w1, b1, w2, b2)
    out = jax.block_until_ready(out)

    # Reference with the same bf16-in / f32-accumulate arithmetic as the kernel.
    xb = x.astype(jnp.bfloat16)
    w0b, w1b, w2b = (w.astype(jnp.bfloat16) for w in (w0, w1, w2))
    h1 = jnp.maximum(jnp.dot(xb, w0b, preferred_element_type=jnp.float32) + b0, 0.0)
    h2 = jnp.maximum(
        jnp.dot(h1.astype(jnp.bfloat16), w1b, preferred_element_type=jnp.float32) + b1, 0.0)
    h3 = jnp.dot(h2.astype(jnp.bfloat16), w2b, preferred_element_type=jnp.float32) + b2
    ref = jax.nn.log_softmax(h3, axis=1)

    assert out.shape == (B, D_OUT)
    assert jnp.allclose(out, ref, atol=1e-2, rtol=1e-2), float(jnp.max(jnp.abs(out - ref)))

    print("KERNEL_OK")
</pallas_src>

<mosaic_0001>
module attributes {stable_mosaic.version = 11 : i64} {
  func.func @_mlp_kernel(%arg0: i32, %arg1: memref<8x896xbf16, #tpu.memory_space<vmem>>, %arg2: memref<896x256xbf16, #tpu.memory_space<vmem>>, %arg3: memref<1x256xf32, #tpu.memory_space<vmem>>, %arg4: memref<256x256xbf16, #tpu.memory_space<vmem>>, %arg5: memref<1x256xf32, #tpu.memory_space<vmem>>, %arg6: memref<256x128xbf16, #tpu.memory_space<vmem>>, %arg7: memref<1x128xf32, #tpu.memory_space<vmem>>, %arg8: memref<8x128xf32, #tpu.memory_space<vmem>>) attributes {dimension_semantics = [#tpu.dimension_semantics<parallel>], iteration_bounds = array<i64: 1>, scalar_prefetch = 0 : i64, scratch_operands = 0 : i64, tpu.core_type = #tpu.core_type<tc>, window_params = [{transform_indices = @transform_0, window_bounds = array<i64: 8, 896>}, {pipeline_mode = #tpu.pipeline_mode<synchronous>, transform_indices = @transform_1, window_bounds = array<i64: 896, 256>}, {pipeline_mode = #tpu.pipeline_mode<synchronous>, transform_indices = @transform_2, window_bounds = array<i64: 1, 256>}, {pipeline_mode = #tpu.pipeline_mode<synchronous>, transform_indices = @transform_3, window_bounds = array<i64: 256, 256>}, {pipeline_mode = #tpu.pipeline_mode<synchronous>, transform_indices = @transform_4, window_bounds = array<i64: 1, 256>}, {pipeline_mode = #tpu.pipeline_mode<synchronous>, transform_indices = @transform_5, window_bounds = array<i64: 256, 128>}, {pipeline_mode = #tpu.pipeline_mode<synchronous>, transform_indices = @transform_6, window_bounds = array<i64: 1, 128>}, {transform_indices = @transform_7, window_bounds = array<i64: 8, 128>}]} {
    %c0 = arith.constant 0 : index
    %c0_0 = arith.constant 0 : index
    %0 = vector.load %arg1[%c0, %c0_0] : memref<8x896xbf16, #tpu.memory_space<vmem>>, vector<8x896xbf16>
    %c0_1 = arith.constant 0 : index
    %c0_2 = arith.constant 0 : index
    %1 = vector.load %arg2[%c0_1, %c0_2] : memref<896x256xbf16, #tpu.memory_space<vmem>>, vector<896x256xbf16>
    %cst = arith.constant dense<0.000000e+00> : vector<8x256xf32>
    %2 = tpu.matmul %0, %1, %cst {dimension_numbers = #tpu.dot_dimension_numbers<[1], [0], [0], [1], [0, 0, 1, 1], [], []>} : vector<8x896xbf16>, vector<896x256xbf16>, vector<8x256xf32> -> vector<8x256xf32>
    %c0_3 = arith.constant 0 : index
    %c0_4 = arith.constant 0 : index
    %3 = vector.load %arg3[%c0_3, %c0_4] : memref<1x256xf32, #tpu.memory_space<vmem>>, vector<1x256xf32>
    %4 = vector.broadcast %3 : vector<1x256xf32> to vector<8x256xf32>
    %5 = arith.addf %2, %4 : vector<8x256xf32>
    %cst_5 = arith.constant 0.000000e+00 : f32
    %6 = vector.broadcast %cst_5 : f32 to vector<8x256xf32>
    %7 = arith.maximumf %5, %6 : vector<8x256xf32>
    %8 = arith.truncf %7 : vector<8x256xf32> to vector<8x256xbf16>
    %c0_6 = arith.constant 0 : index
    %c0_7 = arith.constant 0 : index
    %9 = vector.load %arg4[%c0_6, %c0_7] : memref<256x256xbf16, #tpu.memory_space<vmem>>, vector<256x256xbf16>
    %cst_8 = arith.constant dense<0.000000e+00> : vector<8x256xf32>
    %10 = tpu.matmul %8, %9, %cst_8 {dimension_numbers = #tpu.dot_dimension_numbers<[1], [0], [0], [1], [0, 0, 1, 1], [], []>} : vector<8x256xbf16>, vector<256x256xbf16>, vector<8x256xf32> -> vector<8x256xf32>
    %c0_9 = arith.constant 0 : index
    %c0_10 = arith.constant 0 : index
    %11 = vector.load %arg5[%c0_9, %c0_10] : memref<1x256xf32, #tpu.memory_space<vmem>>, vector<1x256xf32>
    %12 = vector.broadcast %11 : vector<1x256xf32> to vector<8x256xf32>
    %13 = arith.addf %10, %12 : vector<8x256xf32>
    %cst_11 = arith.constant 0.000000e+00 : f32
    %14 = vector.broadcast %cst_11 : f32 to vector<8x256xf32>
    %15 = arith.maximumf %13, %14 : vector<8x256xf32>
    %16 = arith.truncf %15 : vector<8x256xf32> to vector<8x256xbf16>
    %c0_12 = arith.constant 0 : index
    %c0_13 = arith.constant 0 : index
    %17 = vector.load %arg6[%c0_12, %c0_13] : memref<256x128xbf16, #tpu.memory_space<vmem>>, vector<256x128xbf16>
    %cst_14 = arith.constant dense<0.000000e+00> : vector<8x128xf32>
    %18 = tpu.matmul %16, %17, %cst_14 {dimension_numbers = #tpu.dot_dimension_numbers<[1], [0], [0], [1], [0, 0, 1, 1], [], []>} : vector<8x256xbf16>, vector<256x128xbf16>, vector<8x128xf32> -> vector<8x128xf32>
    %c0_15 = arith.constant 0 : index
    %c0_16 = arith.constant 0 : index
    %19 = vector.load %arg7[%c0_15, %c0_16] : memref<1x128xf32, #tpu.memory_space<vmem>>, vector<1x128xf32>
    %20 = vector.broadcast %19 : vector<1x128xf32> to vector<8x128xf32>
    %21 = arith.addf %18, %20 : vector<8x128xf32>
    %cst_17 = arith.constant dense<0xFF800000> : vector<8xf32>
    %22 = vector.multi_reduction <maximumf>, %21, %cst_17 [1] : vector<8x128xf32> to vector<8xf32>
    %23 = vector.shape_cast %22 : vector<8xf32> to vector<8x1xf32>
    %24 = vector.broadcast %23 : vector<8x1xf32> to vector<8x128xf32>
    %25 = arith.subf %21, %24 : vector<8x128xf32>
    %26 = math.exp %25 : vector<8x128xf32>
    %cst_18 = arith.constant dense<0.000000e+00> : vector<8xf32>
    %27 = vector.multi_reduction <add>, %26, %cst_18 [1] : vector<8x128xf32> to vector<8xf32>
    %28 = vector.shape_cast %27 : vector<8xf32> to vector<8x1xf32>
    %29 = math.log %28 : vector<8x1xf32>
    %30 = vector.broadcast %29 : vector<8x1xf32> to vector<8x128xf32>
    %31 = arith.subf %25, %30 : vector<8x128xf32>
    %c0_19 = arith.constant 0 : index
    %c0_20 = arith.constant 0 : index
    %32 = vector.load %arg8[%c0_19, %c0_20] : memref<8x128xf32, #tpu.memory_space<vmem>>, vector<8x128xf32>
    tpu.vector_store %arg8[%c0_19, %c0_20], %31 {strides = array<i32>} : memref<8x128xf32, #tpu.memory_space<vmem>>, vector<8x128xf32>,
    return
  }
  func.func @transform_0(%arg0: i32) -> (i32, i32) {
    %c0_i32 = arith.constant 0 : i32
    %c0_i32_0 = arith.constant 0 : i32
    return %arg0, %c0_i32 : i32, i32
  }
  func.func @transform_1(%arg0: i32) -> (i32, i32) {
    %c0_i32 = arith.constant 0 : i32
    %c0_i32_0 = arith.constant 0 : i32
    %c0_i32_1 = arith.constant 0 : i32
    return %c0_i32, %c0_i32_0 : i32, i32
  }
  func.func @transform_2(%arg0: i32) -> (i32, i32) {
    %c0_i32 = arith.constant 0 : i32
    %c0_i32_0 = arith.constant 0 : i32
    %c0_i32_1 = arith.constant 0 : i32
    return %c0_i32, %c0_i32_0 : i32, i32
  }
  func.func @transform_3(%arg0: i32) -> (i32, i32) {
    %c0_i32 = arith.constant 0 : i32
    %c0_i32_0 = arith.constant 0 : i32
    %c0_i32_1 = arith.constant 0 : i32
    return %c0_i32, %c0_i32_0 : i32, i32
  }
  func.func @transform_4(%arg0: i32) -> (i32, i32) {
    %c0_i32 = arith.constant 0 : i32
    %c0_i32_0 = arith.constant 0 : i32
    %c0_i32_1 = arith.constant 0 : i32
    return %c0_i32, %c0_i32_0 : i32, i32
  }
  func.func @transform_5(%arg0: i32) -> (i32, i32) {
    %c0_i32 = arith.constant 0 : i32
    %c0_i32_0 = arith.constant 0 : i32
    %c0_i32_1 = arith.constant 0 : i32
    return %c0_i32, %c0_i32_0 : i32, i32
  }
  func.func @transform_6(%arg0: i32) -> (i32, i32) {
    %c0_i32 = arith.constant 0 : i32
    %c0_i32_0 = arith.constant 0 : i32
    %c0_i32_1 = arith.constant 0 : i32
    return %c0_i32, %c0_i32_0 : i32, i32
  }
  func.func @transform_7(%arg0: i32) -> (i32, i32) {
    %c0_i32 = arith.constant 0 : i32
    %c0_i32_0 = arith.constant 0 : i32
    return %arg0, %c0_i32 : i32, i32
  }
}

</mosaic_0001>

<bundles_post_ra>
// kernel: mnist_mlp_forward.1
= control target key start
LH: loop header
LB: loop body
LE: loop exit
PB: predicated region body
PF: predicated region fallthrough
CT: control target
= control target key end

     0   :  { %s2367_s0 = inlined_call_operand.vmem [shape: bf16[8,896], index: 0, kind: input, shape index: {}]   ;;  %s2368_s1 = inlined_call_operand.vmem [shape: bf16[896,256], index: 1, kind: input, shape index: {}]   ;;  %s2369_s2 = inlined_call_operand.vmem [shape: f32[1,256], index: 2, kind: input, shape index: {}]   ;;  %s2370_s3 = inlined_call_operand.vmem [shape: bf16[256,256], index: 3, kind: input, shape index: {}]   ;;  %s2371_s4 = inlined_call_operand.vmem [shape: f32[1,256], index: 4, kind: input, shape index: {}]   ;;  %s2372_s5 = inlined_call_operand.vmem [shape: bf16[256,128], index: 5, kind: input, shape index: {}]   ;;  %s2373_s6 = inlined_call_operand.vmem [shape: f32[1,128], index: 6, kind: input, shape index: {}]   ;;  %s2374_s7 = inlined_call_operand.hbm [shape: f32[8,128], index: 7, kind: output, shape index: {}]  }
   0x1   :  { %v1550_v0 = vld [vmem:[%s2368_s1 + $0x74] ss:$8 sps:$4 sm:$0xff]   ;;  %v1552_v1 = vld [vmem:[%s2368_s1 + $0x70] ss:$8 sps:$4 sm:$0xff]   ;;  %v1556_v4 = vld [vmem:[%s2368_s1 + $0x64] ss:$8 sps:$4 sm:$0xff]  }
   0x2   :  { %741 = vmatprep.subr.bf16.mxu0 %v1550_v0  ;;  %v1553_v2 = vld [vmem:[%s2368_s1 + $0x174] ss:$8 sps:$4 sm:$0xff]   ;;  %v1555_v3 = vld [vmem:[%s2368_s1 + $0x170] ss:$8 sps:$4 sm:$0xff]   ;;  %v1558_v5 = vld [vmem:[%s2368_s1 + $0x60] ss:$8 sps:$4 sm:$0xff]  }
   0x3   :  { %742 = vmatpush1.bf16.msra.mxu0 %v1552_v1  ;;  %782 = vmatprep.subr.bf16.mxu1 %v1553_v2  ;;  %v1559_v6 = vld [vmem:[%s2368_s1 + $0x164] ss:$8 sps:$4 sm:$0xff]   ;;  %v1561_v7 = vld [vmem:[%s2368_s1 + $0x160] ss:$8 sps:$4 sm:$0xff]   ;;  %v1562_v8 = vld [vmem:[%s2368_s1 + $0x54] ss:$8 sps:$4 sm:$0xff]  }
   0x4   :  { %783 = vmatpush1.bf16.msra.mxu1 %v1555_v3  ;;  %743 = vmatprep.subr.bf16.mxu0 %v1556_v4  ;;  %v1564_v9 = vld [vmem:[%s2368_s1 + $0x50] ss:$8 sps:$4 sm:$0xff]   ;;  %v1565_v10 = vld [vmem:[%s2368_s1 + $0x154] ss:$8 sps:$4 sm:$0xff]   ;;  %v1568_v11 = vld [vmem:[%s2368_s1 + $0x44] ss:$8 sps:$4 sm:$0xff]  }
   0x5   :  { %784 = vmatprep.subr.bf16.mxu1 %v1559_v6  ;;  %v1567_v12 = vld [vmem:[%s2368_s1 + $0x150] ss:$8 sps:$4 sm:$0xff]   ;;  %v1571_v13 = vld [vmem:[%s2368_s1 + $0x144] ss:$8 sps:$4 sm:$0xff]   ;;  %v1570_v14 = vld [vmem:[%s2368_s1 + $0x40] ss:$8 sps:$4 sm:$0xff]  }
   0x6   :  { %v1574_v15 = vld [vmem:[%s2368_s1 + $0x34] ss:$8 sps:$4 sm:$0xff]   ;;  %v1573_v16 = vld [vmem:[%s2368_s1 + $0x140] ss:$8 sps:$4 sm:$0xff]   ;;  %v1576_v18 = vld [vmem:[%s2368_s1 + $0x30] ss:$8 sps:$4 sm:$0xff]  }
   0x7   :  { %744 = vmatpush1.bf16.msra.mxu0 %v1558_v5  ;;  %v1577_v17 = vld [vmem:[%s2368_s1 + $0x134] ss:$8 sps:$4 sm:$0xff]   ;;  %v1580_v19 = vld [vmem:[%s2368_s1 + $0x24] ss:$8 sps:$4 sm:$0xff]   ;;  %v1579_v20 = vld [vmem:[%s2368_s1 + $0x130] ss:$8 sps:$4 sm:$0xff]  }
   0x8   :  { %745 = vmatprep.subr.bf16.mxu0 %v1562_v8  ;;  %785 = vmatpush1.bf16.msra.mxu1 %v1561_v7  ;;  %v1583_v21 = vld [vmem:[%s2368_s1 + $0x124] ss:$8 sps:$4 sm:$0xff]   ;;  %v1582_v22 = vld [vmem:[%s2368_s1 + $0x20] ss:$8 sps:$4 sm:$0xff]   ;;  %v1586_v23 = vld [vmem:[%s2368_s1 + $0x14] ss:$8 sps:$4 sm:$0xff]  }
   0x9   :  { %786 = vmatprep.subr.bf16.mxu1 %v1565_v10  ;;  %v1585_v24 = vld [vmem:[%s2368_s1 + $0x120] ss:$8 sps:$4 sm:$0xff]   ;;  %v1589_v25 = vld [vmem:[%s2368_s1 + $0x114] ss:$8 sps:$4 sm:$0xff]   ;;  %v1588_v26 = vld [vmem:[%s2368_s1 + $0x10] ss:$8 sps:$4 sm:$0xff]  }
   0xa   :  { %v1592_v27 = vld [vmem:[%s2368_s1 + $0x4] ss:$8 sps:$4 sm:$0xff]   ;;  %v1591_v28 = vld [vmem:[%s2368_s1 + $0x110] ss:$8 sps:$4 sm:$0xff]   ;;  %v1594_v30 = vld [vmem:[%s2368_s1] ss:$8 sps:$4 sm:$0xff]  }
   0xb   :  { %746 = vmatpush1.bf16.msra.mxu0 %v1564_v9  ;;  %v1595_v29 = vld [vmem:[%s2368_s1 + $0x104] ss:$8 sps:$4 sm:$0xff]   ;;  %v1598_v31 = vld [vmem:[%s2368_s1 + $0xf4] ss:$8 sps:$4 sm:$0xff]   ;;  %v1597_v32 = vld [vmem:[%s2368_s1 + $0x100] ss:$8 sps:$4 sm:$0xff]  }
   0xc   :  { %747 = vmatprep.subr.bf16.mxu0 %v1568_v11  ;;  %787 = vmatpush1.bf16.msra.mxu1 %v1567_v12  ;;  %v1601_v33 = vld [vmem:[%s2368_s1 + $0x1f4] ss:$8 sps:$4 sm:$0xff]   ;;  %v1600_v34 = vld [vmem:[%s2368_s1 + $0xf0] ss:$8 sps:$4 sm:$0xff]   ;;  %v1604_v35 = vld [vmem:[%s2368_s1 + $0xe4] ss:$8 sps:$4 sm:$0xff]  }
   0xd   :  { %788 = vmatprep.subr.bf16.mxu1 %v1571_v13  ;;  %v1603_v36 = vld [vmem:[%s2368_s1 + $0x1f0] ss:$8 sps:$4 sm:$0xff]   ;;  %v1607_v37 = vld [vmem:[%s2368_s1 + $0x1e4] ss:$8 sps:$4 sm:$0xff]   ;;  %v1606_v38 = vld [vmem:[%s2368_s1 + $0xe0] ss:$8 sps:$4 sm:$0xff]  }
   0xe   :  { %v1610_v39 = vld [vmem:[%s2368_s1 + $0xd4] ss:$8 sps:$4 sm:$0xff]   ;;  %v1609_v40 = vld [vmem:[%s2368_s1 + $0x1e0] ss:$8 sps:$4 sm:$0xff]   ;;  %v1612_v42 = vld [vmem:[%s2368_s1 + $0xd0] ss:$8 sps:$4 sm:$0xff]  }
   0xf   :  { %748 = vmatpush1.bf16.msra.mxu0 %v1570_v14  ;;  %v1613_v41 = vld [vmem:[%s2368_s1 + $0x1d4] ss:$8 sps:$4 sm:$0xff]   ;;  %v1616_v43 = vld [vmem:[%s2368_s1 + $0xc4] ss:$8 sps:$4 sm:$0xff]   ;;  %v1615_v44 = vld [vmem:[%s2368_s1 + $0x1d0] ss:$8 sps:$4 sm:$0xff]  }
  0x10   :  { %749 = vmatprep.subr.bf16.mxu0 %v1574_v15  ;;  %789 = vmatpush1.bf16.msra.mxu1 %v1573_v16  ;;  %v1619_v45 = vld [vmem:[%s2368_s1 + $0x1c4] ss:$8 sps:$4 sm:$0xff]   ;;  %v1618_v47 = vld [vmem:[%s2368_s1 + $0xc0] ss:$8 sps:$4 sm:$0xff]   ;;  %v1622_v49 = vld [vmem:[%s2368_s1 + $0xb4] ss:$8 sps:$4 sm:$0xff]  }
  0x11   :  { %790 = vmatprep.subr.bf16.mxu1 %v1577_v17  ;;  %v28_v46 = vld [vmem:[%s2367_s0] sm:$0xff]  ;;  %v29_v50 = vld [vmem:[%s2367_s0 + $0x8] sm:$0xff]  ;;  %v1625_v53 = vld [vmem:[%s2368_s1 + $0x1b4] ss:$8 sps:$4 sm:$0xff]   ;;  %v1815_v15 = vmov 0  }
  0x12   :  { %v1359_v48 = vcombine.high %v28_v46, %v28_v46  ;;  %v1621_v51 = vld [vmem:[%s2368_s1 + $0x1c0] ss:$8 sps:$4 sm:$0xff]   ;;  %v1361_v52 = vcombine.high %v29_v50, %v29_v50  ;;  %v1624_v54 = vld [vmem:[%s2368_s1 + $0xb0] ss:$8 sps:$4 sm:$0xff]   ;;  %v1628_v55 = vld [vmem:[%s2368_s1 + $0xa4] ss:$8 sps:$4 sm:$0xff]   ;;  %v1358_v5 = vcombine.low %v28_v46, %v28_v46  ;;  %v1360_v8 = vcombine.low %v29_v50, %v29_v50 }
  0x13   :  { %750 = vmatpush1.bf16.msra.mxu0 %v1576_v18  ;;  %v1627_v56 = vld [vmem:[%s2368_s1 + $0x1b0] ss:$8 sps:$4 sm:$0xff]   ;;  %v1631_v57 = vld [vmem:[%s2368_s1 + $0x1a4] ss:$8 sps:$4 sm:$0xff]   ;;  %v1630_v58 = vld [vmem:[%s2368_s1 + $0xa0] ss:$8 sps:$4 sm:$0xff]  }
  0x14   :  { %751 = vmatprep.subr.bf16.mxu0 %v1580_v19  ;;  %791 = vmatpush1.bf16.msra.mxu1 %v1579_v20  ;;  %v1634_v59 = vld [vmem:[%s2368_s1 + $0x94] ss:$8 sps:$4 sm:$0xff]   ;;  %v1633_v60 = vld [vmem:[%s2368_s1 + $0x1a0] ss:$8 sps:$4 sm:$0xff]   ;;  %v1636_v62 = vld [vmem:[%s2368_s1 + $0x90] ss:$8 sps:$4 sm:$0xff]  }
  0x15   :  { %792 = vmatprep.subr.bf16.mxu1 %v1583_v21  ;;  %773 = vmatprep.mubr.bf16.mxu0 %v1359_v48  ;;  %v1637_v61 = vld [vmem:[%s2368_s1 + $0x194] ss:$8 sps:$4 sm:$0xff]   ;;  %v1640_v63 = vld [vmem:[%s2368_s1 + $0x84] ss:$8 sps:$4 sm:$0xff]   ;;  %v1639_v0 = vld [vmem:[%s2368_s1 + $0x190] ss:$8 sps:$4 sm:$0xff]  }
  0x16   :  { %814 = vmatprep.mubr.bf16.mxu1 %v1361_v52  ;;  %v1643_v1 = vld [vmem:[%s2368_s1 + $0x184] ss:$8 sps:$4 sm:$0xff]   ;;  %v1642_v2 = vld [vmem:[%s2368_s1 + $0x80] ss:$8 sps:$4 sm:$0xff]   ;;  %v1650_v3 = vld [vmem:[%s2368_s1 + $0x274] ss:$8 sps:$4 sm:$0xff]  }
  0x17   :  { %752 = vmatpush1.bf16.msra.mxu0 %v1582_v22  ;;  %v1647_v4 = vld [vmem:[%s2368_s1 + $0x180] ss:$8 sps:$4 sm:$0xff]   ;;  %v1676_v6 = vld [vmem:[%s2368_s1 + $0x374] ss:$8 sps:$4 sm:$0xff]   ;;  %v1648_v7 = vld [vmem:[%s2368_s1 + $0x270] ss:$8 sps:$4 sm:$0xff]  }
  0x18   :  { %753 = vmatprep.subr.bf16.mxu0 %v1586_v23  ;;  %793 = vmatpush1.bf16.msra.mxu1 %v1585_v24  ;;  %v1655_v9 = vld [vmem:[%s2368_s1 + $0x264] ss:$8 sps:$4 sm:$0xff]   ;;  %v1674_v10 = vld [vmem:[%s2368_s1 + $0x370] ss:$8 sps:$4 sm:$0xff]   ;;  %v1653_v12 = vld [vmem:[%s2368_s1 + $0x260] ss:$8 sps:$4 sm:$0xff]  }
  0x19   :  { %794 = vmatprep.subr.bf16.mxu1 %v1589_v25  ;;  %v1682_v11 = vld [vmem:[%s2368_s1 + $0x364] ss:$8 sps:$4 sm:$0xff]   ;;  %v1658_v13 = vld [vmem:[%s2368_s1 + $0x254] ss:$8 sps:$4 sm:$0xff]   ;;  %v1680_v14 = vld [vmem:[%s2368_s1 + $0x360] ss:$8 sps:$4 sm:$0xff]  }
  0x1a   :  { %v1688_v16 = vld [vmem:[%s2368_s1 + $0x354] ss:$8 sps:$4 sm:$0xff]   ;;  %v1656_v17 = vld [vmem:[%s2368_s1 + $0x250] ss:$8 sps:$4 sm:$0xff]   ;;  %v1661_v18 = vld [vmem:[%s2368_s1 + $0x244] ss:$8 sps:$4 sm:$0xff]  }
  0x1b   :  { %754 = vmatpush1.bf16.msra.mxu0 %v1588_v26  ;;  %v1659_v19 = vld [vmem:[%s2368_s1 + $0x240] ss:$8 sps:$4 sm:$0xff]   ;;  %v1686_v20 = vld [vmem:[%s2368_s1 + $0x350] ss:$8 sps:$4 sm:$0xff]   ;;  %v1694_v21 = vld [vmem:[%s2368_s1 + $0x344] ss:$8 sps:$4 sm:$0xff]  }
  0x1c   :  { %755 = vmatprep.subr.bf16.mxu0 %v1592_v27  ;;  %795 = vmatpush1.bf16.msra.mxu1 %v1591_v28  ;;  %v1664_v22 = vld [vmem:[%s2368_s1 + $0x234] ss:$8 sps:$4 sm:$0xff]   ;;  %v1692_v23 = vld [vmem:[%s2368_s1 + $0x340] ss:$8 sps:$4 sm:$0xff]   ;;  %v1662_v26 = vld [vmem:[%s2368_s1 + $0x230] ss:$8 sps:$4 sm:$0xff]  }
  0x1d   :  { %796 = vmatprep.subr.bf16.mxu1 %v1595_v29  ;;  %v1700_v24 = vld [vmem:[%s2368_s1 + $0x334] ss:$8 sps:$4 sm:$0xff]   ;;  %v1667_v28 = vld [vmem:[%s2368_s1 + $0x224] ss:$8 sps:$4 sm:$0xff]   ;;  %v1698_v29 = vld [vmem:[%s2368_s1 + $0x330] ss:$8 sps:$4 sm:$0xff]  }
  0x1e   :  { %v2112_v25 = vld [vmem:[%s2367_s0 + $0x10] sm:$0xff] }
  0x1f   :  { %756 = vmatpush1.bf16.msra.mxu0 %v1594_v30  ;;  %v1363_v27 = vcombine.high %v2112_v25, %v2112_v25  ;;  %v1706_v30 = vld [vmem:[%s2368_s1 + $0x324] ss:$8 sps:$4 sm:$0xff]  }
  0x20   :  { %757 = vmatprep.subr.bf16.mxu0 %v1598_v31  ;;  %797 = vmatpush1.bf16.msra.mxu1 %v1597_v32  ;;  %v1665_v31 = vld [vmem:[%s2368_s1 + $0x220] ss:$8 sps:$4 sm:$0xff]   ;;  %v1670_v32 = vld [vmem:[%s2368_s1 + $0x214] ss:$8 sps:$4 sm:$0xff]  }
  0x21   :  { %798 = vmatprep.subr.bf16.mxu1 %v1601_v33  ;;  %v1704_v33 = vld [vmem:[%s2368_s1 + $0x320] ss:$8 sps:$4 sm:$0xff]  }
  0x23   :  { %758 = vmatpush2.bf16.msra.mxu0 %v1600_v34  ;;  %v1712_v34 = vld [vmem:[%s2368_s1 + $0x314] ss:$8 sps:$4 sm:$0xff]  }
  0x24   :  { %759 = vmatprep.subr.bf16.mxu0 %v1604_v35  ;;  %799 = vmatpush2.bf16.msra.mxu1 %v1603_v36  ;;  %v1668_v35 = vld [vmem:[%s2368_s1 + $0x210] ss:$8 sps:$4 sm:$0xff]   ;;  %v1673_v36 = vld [vmem:[%s2368_s1 + $0x204] ss:$8 sps:$4 sm:$0xff]  }
  0x25   :  { %800 = vmatprep.subr.bf16.mxu1 %v1607_v37  ;;  %v1710_v37 = vld [vmem:[%s2368_s1 + $0x310] ss:$8 sps:$4 sm:$0xff]  }
  0x27   :  { %760 = vmatpush2.bf16.msra.mxu0 %v1606_v38  ;;  %v1718_v38 = vld [vmem:[%s2368_s1 + $0x304] ss:$8 sps:$4 sm:$0xff]  }
  0x28   :  { %761 = vmatprep.subr.bf16.mxu0 %v1610_v39  ;;  %801 = vmatpush2.bf16.msra.mxu1 %v1609_v40  ;;  %v1671_v39 = vld [vmem:[%s2368_s1 + $0x200] ss:$8 sps:$4 sm:$0xff]   ;;  %v1679_v40 = vld [vmem:[%s2368_s1 + $0x2f4] ss:$8 sps:$4 sm:$0xff]  }
  0x29   :  { %802 = vmatprep.subr.bf16.mxu1 %v1613_v41  ;;  %v1716_v41 = vld [vmem:[%s2368_s1 + $0x300] ss:$8 sps:$4 sm:$0xff]  }
  0x2b   :  { %762 = vmatpush2.bf16.msra.mxu0 %v1612_v42  ;;  %v1677_v42 = vld [vmem:[%s2368_s1 + $0x2f0] ss:$8 sps:$4 sm:$0xff]  }
  0x2c   :  { %763 = vmatprep.subr.bf16.mxu0 %v1616_v43  ;;  %803 = vmatpush2.bf16.msra.mxu1 %v1615_v44  ;;  %v1685_v43 = vld [vmem:[%s2368_s1 + $0x2e4] ss:$8 sps:$4 sm:$0xff]   ;;  %v1722_v44 = vld [vmem:[%s2367_s0 + $0x18] ss:$0 sps:$4 sm:$0xff]  }
  0x2d   :  { %804 = vmatprep.subr.bf16.mxu1 %v1619_v45 }
  0x2f   :  { %764 = vmatpush2.bf16.msra.mxu0 %v1618_v47 }
  0x30   :  { %765 = vmatprep.subr.bf16.mxu0 %v1622_v49  ;;  %805 = vmatpush2.bf16.msra.mxu1 %v1621_v51 }
  0x31   :  { %806 = vmatprep.subr.bf16.mxu1 %v1625_v53 }
  0x33   :  { %766 = vmatpush2.bf16.msra.mxu0 %v1624_v54 }
  0x34   :  { %767 = vmatprep.subr.bf16.mxu0 %v1628_v55  ;;  %807 = vmatpush2.bf16.msra.mxu1 %v1627_v56 }
  0x35   :  { %808 = vmatprep.subr.bf16.mxu1 %v1631_v57 }
  0x37   :  { %768 = vmatpush2.bf16.msra.mxu0 %v1630_v58 }
  0x38   :  { %769 = vmatprep.subr.bf16.mxu0 %v1634_v59  ;;  %809 = vmatpush2.bf16.msra.mxu1 %v1633_v60 }
  0x39   :  { %810 = vmatprep.subr.bf16.mxu1 %v1637_v61 }
  0x3b   :  { %770 = vmatpush2.bf16.msra.mxu0 %v1636_v62 }
  0x3c   :  { %771 = vmatprep.subr.bf16.mxu0 %v1640_v63  ;;  %811 = vmatpush2.bf16.msra.mxu1 %v1639_v0 }
  0x3d   :  { %812 = vmatprep.subr.bf16.mxu1 %v1643_v1 }
  0x3f   :  { %772 = vmatpush2.bf16.msra.mxu0 %v1642_v2 }
  0x40   :  { %823 = vmatprep.subr.bf16.mxu0 %v1650_v3  ;;  %813 = vmatpush2.bf16.msra.mxu1 %v1647_v4 }
  0x41   :  { %864 = vmatprep.subr.bf16.mxu1 %v1676_v6 }
  0x42   :  { %774 = vmatmul.mubr.bf16.vlgmr.msra.gmra.mxu0 %v1358_v5 }
  0x43   :  { %824 = vmatpush1.bf16.msra.mxu0 %v1648_v7  ;;  %815 = vmatmul.mubr.bf16.vlgmr.msra.gmra.mxu1 %v1360_v8 }
  0x44   :  { %825 = vmatprep.subr.bf16.mxu0 %v1655_v9  ;;  %865 = vmatpush1.bf16.msra.mxu1 %v1674_v10 }
  0x45   :  { %896 = vmatprep.mubr.bf16.mxu1 %v1815_v15  ;;  %866 = vmatprep.subr.bf16.mxu1 %v1682_v11 }
  0x46   :  { %855 = vmatprep.mubr.bf16.mxu0 %v1363_v27 }
  0x47   :  { %826 = vmatpush1.bf16.msra.mxu0 %v1653_v12 }
  0x48   :  { %827 = vmatprep.subr.bf16.mxu0 %v1658_v13  ;;  %867 = vmatpush1.bf16.msra.mxu1 %v1680_v14 }
  0x49   :  { %868 = vmatprep.subr.bf16.mxu1 %v1688_v16 }
  0x4b   :  { %828 = vmatpush1.bf16.msra.mxu0 %v1656_v17 }
  0x4c   :  { %829 = vmatprep.subr.bf16.mxu0 %v1661_v18  ;;  %869 = vmatpush1.bf16.msra.mxu1 %v1686_v20 }
  0x4d   :  { %870 = vmatprep.subr.bf16.mxu1 %v1694_v21 }
  0x4f   :  { %830 = vmatpush1.bf16.msra.mxu0 %v1659_v19 }
  0x50   :  { %831 = vmatprep.subr.bf16.mxu0 %v1664_v22  ;;  %871 = vmatpush1.bf16.msra.mxu1 %v1692_v23 }
  0x51   :  { %872 = vmatprep.subr.bf16.mxu1 %v1700_v24 }
  0x53   :  { %832 = vmatpush1.bf16.msra.mxu0 %v1662_v26 }
  0x54   :  { %833 = vmatprep.subr.bf16.mxu0 %v1667_v28  ;;  %873 = vmatpush1.bf16.msra.mxu1 %v1698_v29 }
  0x55   :  { %874 = vmatprep.subr.bf16.mxu1 %v1706_v30 }
  0x57   :  { %834 = vmatpush1.bf16.msra.mxu0 %v1665_v31 }
  0x58   :  { %835 = vmatprep.subr.bf16.mxu0 %v1670_v32  ;;  %875 = vmatpush1.bf16.msra.mxu1 %v1704_v33 }
  0x59   :  { %876 = vmatprep.subr.bf16.mxu1 %v1712_v34 }
  0x5b   :  { %836 = vmatpush1.bf16.msra.mxu0 %v1668_v35 }
  0x5c   :  { %837 = vmatprep.subr.bf16.mxu0 %v1673_v36  ;;  %877 = vmatpush1.bf16.msra.mxu1 %v1710_v37 }
  0x5d   :  { %878 = vmatprep.subr.bf16.mxu1 %v1718_v38 }
  0x5f   :  { %838 = vmatpush1.bf16.msra.mxu0 %v1671_v39 }
  0x60   :  { %839 = vmatprep.subr.bf16.mxu0 %v1679_v40  ;;  %879 = vmatpush1.bf16.msra.mxu1 %v1716_v41 }
  0x61   :  { %12 = vsyncpa [#allocation3], 0  ;;  %v1683_v45 = vld [vmem:[%s2368_s1 + $0x2e0] ss:$8 sps:$4 sm:$0xff]   ;;  %v1691_v46 = vld [vmem:[%s2368_s1 + $0x2d4] ss:$8 sps:$4 sm:$0xff]   ;;  %v1362_v58 = vcombine.low %v2112_v25, %v2112_v25 }
  0x62   :  { %v1689_v47 = vld [vmem:[%s2368_s1 + $0x2d0] ss:$8 sps:$4 sm:$0xff]   ;;  %v1697_v48 = vld [vmem:[%s2368_s1 + $0x2c4] ss:$8 sps:$4 sm:$0xff]   ;;  %v1695_v49 = vld [vmem:[%s2368_s1 + $0x2c0] ss:$8 sps:$4 sm:$0xff]  }
  0x63   :  { %840 = vmatpush2.bf16.msra.mxu0 %v1677_v42  ;;  %897 = vmatmul.mubr.bf16.vlgmr.msra.gmra.mxu1 %v1722_v44  ;;  %v1703_v50 = vld [vmem:[%s2368_s1 + $0x2b4] ss:$8 sps:$4 sm:$0xff]   ;;  %v1701_v51 = vld [vmem:[%s2368_s1 + $0x2b0] ss:$8 sps:$4 sm:$0xff]   ;;  %v1709_v52 = vld [vmem:[%s2368_s1 + $0x2a4] ss:$8 sps:$4 sm:$0xff]  }
  0x64   :  { %841 = vmatprep.subr.bf16.mxu0 %v1685_v43  ;;  %v1707_v53 = vld [vmem:[%s2368_s1 + $0x2a0] ss:$8 sps:$4 sm:$0xff]   ;;  %v1715_v54 = vld [vmem:[%s2368_s1 + $0x294] ss:$8 sps:$4 sm:$0xff]   ;;  %v1713_v55 = vld [vmem:[%s2368_s1 + $0x290] ss:$8 sps:$4 sm:$0xff]  }
  0x65   :  { %v1721_v56 = vld [vmem:[%s2368_s1 + $0x284] ss:$8 sps:$4 sm:$0xff]   ;;  %v1719_v57 = vld [vmem:[%s2368_s1 + $0x280] ss:$8 sps:$4 sm:$0xff]   ;;  %v1725_v59 = vld [vmem:[%s2370_s3 + $0x70] ss:$8 sps:$4 sm:$0xff]  }
  0x66   :  { %v1727_v60 = vld [vmem:[%s2370_s3 + $0x74] ss:$8 sps:$4 sm:$0xff]   ;;  %v1730_v61 = vld [vmem:[%s2370_s3 + $0x64] ss:$8 sps:$4 sm:$0xff]   ;;  %v1728_v62 = vld [vmem:[%s2370_s3 + $0x60] ss:$8 sps:$4 sm:$0xff]  }
  0x67   :  { %842 = vmatpush2.bf16.msra.mxu0 %v1683_v45  ;;  %1113 = vmatprep.subr.bf16.mxu1 %v1727_v60  ;;  %v1733_v63 = vld [vmem:[%s2370_s3 + $0x54] ss:$8 sps:$4 sm:$0xff]   ;;  %v1731_v0 = vld [vmem:[%s2370_s3 + $0x50] ss:$8 sps:$4 sm:$0xff]   ;;  %v1736_v1 = vld [vmem:[%s2370_s3 + $0x44] ss:$8 sps:$4 sm:$0xff]  }
  0x68   :  { %843 = vmatprep.subr.bf16.mxu0 %v1691_v46  ;;  %1114 = vmatpush1.bf16.msra.mxu1 %v1725_v59  ;;  %v1734_v2 = vld [vmem:[%s2370_s3 + $0x40] ss:$8 sps:$4 sm:$0xff]   ;;  %v1739_v3 = vld [vmem:[%s2370_s3 + $0x34] ss:$8 sps:$4 sm:$0xff]   ;;  %v1737_v4 = vld [vmem:[%s2370_s3 + $0x30] ss:$8 sps:$4 sm:$0xff]  }
  0x69   :  { %1115 = vmatprep.subr.bf16.mxu1 %v1730_v61  ;;  %v1742_v5 = vld [vmem:[%s2370_s3 + $0x24] ss:$8 sps:$4 sm:$0xff]   ;;  %v1740_v6 = vld [vmem:[%s2370_s3 + $0x20] ss:$8 sps:$4 sm:$0xff]   ;;  %v1745_v7 = vld [vmem:[%s2370_s3 + $0x14] ss:$8 sps:$4 sm:$0xff]  }
  0x6a   :  { %v1743_v8 = vld [vmem:[%s2370_s3 + $0x10] ss:$8 sps:$4 sm:$0xff]   ;;  %v1748_v9 = vld [vmem:[%s2370_s3 + $0x4] ss:$8 sps:$4 sm:$0xff]   ;;  %v1746_v10 = vld [vmem:[%s2370_s3] ss:$8 sps:$4 sm:$0xff]  }
  0x6b   :  { %844 = vmatpush2.bf16.msra.mxu0 %v1689_v47  ;;  %v1751_v11 = vld [vmem:[%s2370_s3 + $0xf4] ss:$8 sps:$4 sm:$0xff]   ;;  %v1749_v12 = vld [vmem:[%s2370_s3 + $0xf0] ss:$8 sps:$4 sm:$0xff]   ;;  %v1754_v13 = vld [vmem:[%s2370_s3 + $0xe4] ss:$8 sps:$4 sm:$0xff]  }
  0x6c   :  { %845 = vmatprep.subr.bf16.mxu0 %v1697_v48  ;;  %1116 = vmatpush1.bf16.msra.mxu1 %v1728_v62  ;;  %v1752_v14 = vld [vmem:[%s2370_s3 + $0xe0] ss:$8 sps:$4 sm:$0xff]   ;;  %v1757_v15 = vld [vmem:[%s2370_s3 + $0xd4] ss:$8 sps:$4 sm:$0xff]   ;;  %v1755_v16 = vld [vmem:[%s2370_s3 + $0xd0] ss:$8 sps:$4 sm:$0xff]  }
  0x6d   :  { %1117 = vmatprep.subr.bf16.mxu1 %v1733_v63  ;;  %v1760_v17 = vld [vmem:[%s2370_s3 + $0xc4] ss:$8 sps:$4 sm:$0xff]   ;;  %v1758_v18 = vld [vmem:[%s2370_s3 + $0xc0] ss:$8 sps:$4 sm:$0xff]   ;;  %v1763_v19 = vld [vmem:[%s2370_s3 + $0xb4] ss:$8 sps:$4 sm:$0xff]  }
  0x6e   :  { %v1761_v20 = vld [vmem:[%s2370_s3 + $0xb0] ss:$8 sps:$4 sm:$0xff]   ;;  %v1766_v21 = vld [vmem:[%s2370_s3 + $0xa4] ss:$8 sps:$4 sm:$0xff]   ;;  %v1764_v22 = vld [vmem:[%s2370_s3 + $0xa0] ss:$8 sps:$4 sm:$0xff]  }
  0x6f   :  { %846 = vmatpush2.bf16.msra.mxu0 %v1695_v49  ;;  %v1769_v23 = vld [vmem:[%s2370_s3 + $0x94] ss:$8 sps:$4 sm:$0xff]   ;;  %v1767_v24 = vld [vmem:[%s2370_s3 + $0x90] ss:$8 sps:$4 sm:$0xff]   ;;  %v1772_v25 = vld [vmem:[%s2370_s3 + $0x84] ss:$8 sps:$4 sm:$0xff]  }
  0x70   :  { %847 = vmatprep.subr.bf16.mxu0 %v1703_v50  ;;  %1118 = vmatpush1.bf16.msra.mxu1 %v1731_v0  ;;  %v1770_v26 = vld [vmem:[%s2370_s3 + $0x80] ss:$8 sps:$4 sm:$0xff]   ;;  %v1773_v27 = vld [vmem:[%s2372_s5 + $0x78] sm:$0xff]   ;;  %v1775_v29 = vld [vmem:[%s2372_s5 + $0x70] sm:$0xff]  }
  0x71   :  { %1119 = vmatprep.subr.bf16.mxu1 %v1736_v1  ;;  %v1774_v28 = vld [vmem:[%s2372_s5 + $0x38] sm:$0xff]   ;;  %v1776_v30 = vld [vmem:[%s2372_s5 + $0x30] sm:$0xff]   ;;  %v1777_v31 = vld [vmem:[%s2372_s5 + $0x68] sm:$0xff]  }
  0x72   :  { %v1778_v32 = vld [vmem:[%s2372_s5 + $0x28] sm:$0xff]   ;;  %v1779_v33 = vld [vmem:[%s2372_s5 + $0x60] sm:$0xff]   ;;  %v1781_v35 = vld [vmem:[%s2372_s5 + $0x58] sm:$0xff]  }
  0x73   :  { %848 = vmatpush2.bf16.msra.mxu0 %v1701_v51  ;;  %v1780_v34 = vld [vmem:[%s2372_s5 + $0x20] sm:$0xff]   ;;  %v1782_v36 = vld [vmem:[%s2372_s5 + $0x18] sm:$0xff]   ;;  %v1783_v37 = vld [vmem:[%s2372_s5 + $0x50] sm:$0xff]   ;;  %v146_v51 = vlaneseq }
  0x74   :  { %849 = vmatprep.subr.bf16.mxu0 %v1709_v52  ;;  %1120 = vmatpush1.bf16.msra.mxu1 %v1734_v2  ;;  %v1784_v38 = vld [vmem:[%s2372_s5 + $0x10] sm:$0xff]  }
  0x75   :  { %1121 = vmatprep.subr.bf16.mxu1 %v1739_v3  ;;  %v147_v52 = vshrl.u32 %v146_v51, 7 }
  0x77   :  { %850 = vmatpush2.bf16.msra.mxu0 %v1707_v53  ;;  %v148_v53 = vsub.s32 0, %v147_v52 }
  0x78   :  { %851 = vmatprep.subr.bf16.mxu0 %v1715_v54  ;;  %1122 = vmatpush1.bf16.msra.mxu1 %v1737_v4  ;;  %v144_v54 = vld [vmem:[%s2369_s2] sm:$0x3] }
  0x79   :  { %1123 = vmatprep.subr.bf16.mxu1 %v1742_v5 }
  0x7b   :  { %852 = vmatpush2.bf16.msra.mxu0 %v1713_v55  ;;  %v152_v55 = vsub.s32 1, %v147_v52 }
  0x7c   :  { %853 = vmatprep.subr.bf16.mxu0 %v1721_v56  ;;  %1124 = vmatpush1.bf16.msra.mxu1 %v1740_v6  ;;  %v149_v56 = vrot.slane %v144_v54, %v148_v53 }
  0x7d   :  { %1125 = vmatprep.subr.bf16.mxu1 %v1745_v7 }
  0x7f   :  { %854 = vmatpush2.bf16.msra.mxu0 %v1719_v57  ;;  %v153_v57 = vrot.slane %v144_v54, %v152_v55 }
  0x80   :  { %1126 = vmatpush1.bf16.msra.mxu1 %v1743_v8  ;;  %1526 = vmatprep.subr.bf16.mxu0 %v1773_v27 }
  0x81   :  { %1127 = vmatprep.subr.bf16.mxu1 %v1748_v9 }
  0x82   :  { %856 = vmatmul.mubr.bf16.vlgmr.msra.gmra.mxu0 %v1362_v58 }
  0x83   :  { %1527 = vmatpush3.bf16.msra.mxu0 %v1774_v28 }
  0x84   :  { %1128 = vmatpush1.bf16.msra.mxu1 %v1746_v10  ;;  %1528 = vmatprep.subr.bf16.mxu0 %v1775_v29  ;;  %v1785_v10 = vld [vmem:[%s2372_s5 + $0x48] sm:$0xff]   ;;  %v1509_v29 = vld [vmem:[%s2373_s6] ss:$0 sm:$0xff] }
  0x85   :  { %1129 = vmatprep.subr.bf16.mxu1 %v1751_v11  ;;  %v1786_v11 = vld [vmem:[%s2372_s5 + $0x8] sm:$0xff]  }
  0x87   :  { %1529 = vmatpush3.bf16.msra.mxu0 %v1776_v30 }
  0x88   :  { %1130 = vmatpush2.bf16.msra.mxu1 %v1749_v12  ;;  %1530 = vmatprep.subr.bf16.mxu0 %v1777_v31  ;;  %v1787_v12 = vld [vmem:[%s2372_s5 + $0x40] sm:$0xff]  }
  0x89   :  { %1131 = vmatprep.subr.bf16.mxu1 %v1754_v13  ;;  %v1788_v13 = vld [vmem:[%s2372_s5] sm:$0xff]  }
  0x8b   :  { %1531 = vmatpush3.bf16.msra.mxu0 %v1778_v32 }
  0x8c   :  { %1132 = vmatpush2.bf16.msra.mxu1 %v1752_v14  ;;  %1532 = vmatprep.subr.bf16.mxu0 %v1779_v33  ;;  %v941_v14 = vld [vmem:[%s2371_s4] sm:$0x3]  ;;  %s1816_s4 = smov [#allocation2]  }
  0x8d   :  { %1133 = vmatprep.subr.bf16.mxu1 %v1757_v15  ;;  %v946_v15 = vrot.slane %v941_v14, %v148_v53  ;;  %s1350_s23 = sshll.u32 %s1816_s4, 4  ;;  %s1351_s23 = int_to_ptr.vmem [resolvable:$true] %s1350_s23 }
  0x8e   :  { %s1793_s6 = scalar_lea.vmem %s1351_s23, 128  ;;  %p1798_p1 = scmp.lt.s32.totalorder %s1351_s23, %s1351_s23 }
  0x8f   :  { %1533 = vmatpush3.bf16.msra.mxu0 %v1780_v34  ;;  %p1794_p0 = scmp.ne.s32.totalorder %s1351_s23, %s1793_s6  ;;  %p1799_p2 = scmp.lt.s32.totalorder %s1793_s6, %s1793_s6 }
  0x90   :  { %1134 = vmatpush2.bf16.msra.mxu1 %v1755_v16  ;;  %1534 = vmatprep.subr.bf16.mxu0 %v1781_v35  ;;  %v950_v16 = vrot.slane %v941_v14, %v152_v55 }
  0x91   :  { %1135 = vmatprep.subr.bf16.mxu1 %v1760_v17  ;;  %p1800_p3 = por %p1799_p2, %p1798_p1 }
  0x93   :  { %1535 = vmatpush3.bf16.msra.mxu0 %v1782_v36  ;;  %p1801_p4 = pnand %p1800_p3, %p1794_p0 }
  0x94   :  { %1136 = vmatpush2.bf16.msra.mxu1 %v1758_v18  ;;  %1536 = vmatprep.subr.bf16.mxu0 %v1783_v37 }
  0x95   :  { %1137 = vmatprep.subr.bf16.mxu1 %v1763_v19 }
  0x97   :  { %1537 = vmatpush3.bf16.msra.mxu0 %v1784_v38 }
  0x98   :  { %1138 = vmatpush2.bf16.msra.mxu1 %v1761_v20  ;;  %1538 = vmatprep.subr.bf16.mxu0 %v1785_v10 }
  0x99   :  { %1139 = vmatprep.subr.bf16.mxu1 %v1766_v21 }
  0x9b   :  { %1539 = vmatpush3.bf16.msra.mxu0 %v1786_v11 }
  0x9c   :  { %1140 = vmatpush2.bf16.msra.mxu1 %v1764_v22  ;;  %1540 = vmatprep.subr.bf16.mxu0 %v1787_v12 }
  0x9d   :  { %1141 = vmatprep.subr.bf16.mxu1 %v1769_v23 }
  0x9f   :  { %1541 = vmatpush3.bf16.msra.mxu0 %v1788_v13 }
  0xa0   :  { %1142 = vmatpush2.bf16.msra.mxu1 %v1767_v24 }
  0xa1   :  { %1143 = vmatprep.subr.bf16.mxu1 %v1772_v25 }
  0xa4   :  { %1144 = vmatpush2.bf16.msra.mxu1 %v1770_v26 }
 0x102   :  { %v775_v39 = vpop.f32.mrf.mxu0 }
 0x103   :  { %v816_v41 = vpop.f32.mrf.mxu1  ;;  %v776_v58 = vadd.f32 %v775_v39, %v149_v56 }
 0x104   :  { %v777_v40 = vpop.f32.mrf.mxu0 }
 0x105   :  { %v818_v43 = vpop.f32.mrf.mxu1  ;;  %v778_v59 = vadd.f32 %v777_v40, %v153_v57  ;;  %v817_v60 = vadd.f32 %v816_v41, %v776_v58 }
 0x106   :  { %v779_v42 = vpop.f32.mrf.mxu0 }
 0x107   :  { %v820_v45 = vpop.f32.mrf.mxu1  ;;  %v819_v62 = vadd.f32 %v818_v43, %v778_v59 }
 0x108   :  { %v780_v44 = vpop.f32.mrf.mxu0 }
 0x109   :  { %v821_v46 = vpop.f32.mrf.mxu1 }
 0x123   :  { %v898_v47 = vpop.f32.mrf.mxu1 }
 0x125   :  { %v900_v48 = vpop.f32.mrf.mxu1 }
 0x127   :  { %v902_v49 = vpop.f32.mrf.mxu1 }
 0x129   :  { %v903_v50 = vpop.f32.mrf.mxu1 }
 0x142   :  { %v857_v61 = vpop.f32.mrf.mxu0 }
 0x143   :  { %v858_v63 = vadd.f32 %v857_v61, %v817_v60 }
 0x144   :  { %v859_v0 = vpop.f32.mrf.mxu0 }
 0x145   :  { %v899_v1 = vadd.f32 %v898_v47, %v858_v63  ;;  %v860_v2 = vadd.f32 %v859_v0, %v819_v62 }
 0x146   :  { %v861_v3 = vpop.f32.mrf.mxu0 }
 0x147   :  { %v901_v4 = vadd.f32 %v900_v48, %v860_v2  ;;  %v905_v5 = vmax.f32 %v899_v1, 0.0 }
 0x148   :  { %v862_v6 = vpop.f32.mrf.mxu0 }
 0x149   :  { %v906_v7 = vmax.f32 %v901_v4, 0.0  ;;  %v907_v9 = vpack.c.bf16 %v905_v5, %v905_v5 }
 0x14b   :  { %v908_v8 = vpack.c.bf16 %v906_v7, %v906_v7 }
 0x14d   :  { %1145 = vmatprep.mubr.bf16.mxu1 %v908_v8 }
 0x14e   :  { %1146 = vmatmul.mubr.bf16.vlgmr.msra.gmra.mxu1 %v907_v9 }
 0x20e   :  { %v1147_v17 = vpop.f32.mrf.mxu1 }
 0x20f   :  { %v1148_v18 = vadd.f32 %v1147_v17, %v946_v15 }
 0x210   :  { %v1149_v19 = vpop.f32.mrf.mxu1 }
 0x211   :  { %v1150_v20 = vadd.f32 %v1149_v19, %v950_v16  ;;  %v1154_v21 = vmax.f32 %v1148_v18, 0.0 }
 0x212   :  { %v1151_v22 = vpop.f32.mrf.mxu1 }
 0x213   :  { %v1155_v23 = vmax.f32 %v1150_v20, 0.0  ;;  %v1156_v26 = vpack.c.bf16 %v1154_v21, %v1154_v21 }
 0x214   :  { %v1152_v24 = vpop.f32.mrf.mxu1 }
 0x215   :  { %v1157_v25 = vpack.c.bf16 %v1155_v23, %v1155_v23 }
 0x217   :  { %1325 = vmatprep.mubr.bf16.mxu0 %v1157_v25 }
 0x218   :  { %1326 = vmatmul.mubr.bf16.vlgmr.msra.gmra.mxu0 %v1156_v26 }
 0x2d8   :  { %v1542_v27 = vpop.f32.mrf.mxu0 }
 0x2da   :  { %v1543_v28 = vpop.f32.mrf.mxu0 }
 0x2db   :  { %v1544_v30 = vadd.f32 %v1543_v28, %v1542_v27 }
 0x2dc   :  { %v1545_v31 = vpop.f32.mrf.mxu0 }
 0x2dd   :  { %v1328_v32 = vadd.f32 %v1544_v30, %v1509_v29 }
 0x2de   :  { %v1546_v33 = vpop.f32.mrf.mxu0 }
 0x2df   :  { %1333 = vmax.xlane.f32.xlu0 %v1328_v32 }
 0x368   :  { %v1334_v34 = vpop.xlane.xlu0 %1333 }
 0x369   :  { %v1335_v35 = vsub.f32 %v1328_v32, %v1334_v34 }
 0x36b   :  { %v1336_v36 = vmul.f32 1.442695, %v1335_v35 }
 0x36d   :  { %1789 = vpow2.f32 %v1336_v36 }
 0x37a   :  { %v1790_v37 = vpop.eup %1789 }
 0x37b   :  { %1338 = vadd.xlane.f32.xlu0 %v1790_v37 }
 0x404   :  { %v1339_v38 = vpop.xlane.xlu0 %1338 }
 0x405   :  { %1791 = vlog2.f32 %v1339_v38 }
 0x412   :  { %v1792_v39 = vpop.eup %1791 }
 0x413   :  { %v1341_v40 = vmul.f32 0.6931472, %v1792_v39 }
 0x415   :  { %v1342_v41 = vsub.f32 %v1335_v35, %v1341_v40 }
 0x417   :  { %1343 = vst [vmem:[#allocation2] sm:$0xff] %v1342_v41 }
 0x418   :  { %1804 = shalt.err (!%p1801_p4)
}
 0x419   :  { %1353 = dma.vmem_to_hbm [thread:$0]  %s1351_s23, 128, %s2374_s7, [#allocation3]  }
 0x41a   :  { %1813 = dma.done.wait [#allocation3], 128  }
 0x41b   :  { %1814 = vsyncadd [#allocation3], 4294967168 }
 0x41c   :  { %1357 = vsyncpa [#allocation3], 1 }

</bundles_post_ra>
